<compile_context>
chip_gen: v7x
topology: tpu7x:2x2x1
jax: 0.10.0
libtpu: 0.0.40
codegen_flags: <defaults>
</compile_context>

<pallas_src>
import functools

import jax
import jax.numpy as jnp
from jax.experimental import pallas as pl
from jax.experimental.pallas import tpu as pltpu

_EPS = 1e-5
_LANE = 128


def _round_up(x, m):
    return ((x + m - 1) // m) * m


# -----------------------------------------------------------------------------
# Simple path: one row-tiled grid, full feature width resident per tile.
# -----------------------------------------------------------------------------
def _layernorm_row_kernel(x_ref, w_ref, b_ref, o_ref, *, d_true):
    # x_ref: (bm, D) in x.dtype; w_ref/b_ref: (1, D); o_ref: (bm, D).
    # D is the true (un-padded) feature count; Mosaic masks the tail vreg for
    # both the reductions and the stores.  Rows past B in a partial last tile
    # hold stale data; their stats are garbage but their writes are masked.
    x = x_ref[...].astype(jnp.float32)
    inv_d = jnp.float32(1.0 / d_true)

    mean = jnp.sum(x, axis=-1, keepdims=True) * inv_d
    xc = x - mean                                   # reused for the affine apply
    var = jnp.sum(xc * xc, axis=-1, keepdims=True) * inv_d   # centered, robust
    inv = jax.lax.rsqrt(var + jnp.float32(_EPS))    # EUP slot, effectively free

    y = xc * inv * w_ref[...].astype(jnp.float32) + b_ref[...].astype(jnp.float32)
    o_ref[...] = y.astype(o_ref.dtype)


# -----------------------------------------------------------------------------
# D-tiled fallback (gigantic D): pass 1 accumulates per-row sum / sumsq over
# feature chunks, pass 2 normalizes + applies the affine per chunk.
# -----------------------------------------------------------------------------
def _stats_kernel(x_ref, mean_ref, inv_ref, s_sc, sq_sc, *, d_true, tk):
    k = pl.program_id(1)

    @pl.when(k == 0)
    def _():
        s_sc[...] = jnp.zeros_like(s_sc)
        sq_sc[...] = jnp.zeros_like(sq_sc)

    x = x_ref[...].astype(jnp.float32)
    # Mask lanes past the true feature count (partial last chunk reads stale
    # VMEM that must not pollute the accumulators).
    col = jax.lax.broadcasted_iota(jnp.int32, x.shape, 1) + k * tk
    x = jnp.where(col < d_true, x, 0.0)

    s_sc[...] += jnp.sum(x, axis=-1, keepdims=True)
    sq_sc[...] += jnp.sum(x * x, axis=-1, keepdims=True)

    @pl.when(k == pl.num_programs(1) - 1)
    def _():
        inv_d = jnp.float32(1.0 / d_true)
        mean = s_sc[...] * inv_d
        # Single-pass variance is unavoidable here (a centered pass would cost
        # a third sweep over HBM); clamp guards the cancellation.
        var = jnp.maximum(sq_sc[...] * inv_d - mean * mean, 0.0)
        mean_ref[...] = mean
        inv_ref[...] = jax.lax.rsqrt(var + jnp.float32(_EPS))


def _apply_kernel(x_ref, w_ref, b_ref, mean_ref, inv_ref, o_ref):
    x = x_ref[...].astype(jnp.float32)
    y = ((x - mean_ref[...]) * inv_ref[...] * w_ref[...].astype(jnp.float32)
         + b_ref[...].astype(jnp.float32))
    o_ref[...] = y.astype(o_ref.dtype)


def _layer_norm_d_tiled(x2, w2, b2, B, D, *, bm, tk, vmem_limit_bytes):
    gi = pl.cdiv(B, bm)
    gk = pl.cdiv(D, tk)

    stats_kernel = functools.partial(_stats_kernel, d_true=D, tk=tk)
    mean, inv = pl.pallas_call(
        stats_kernel,
        out_shape=(jax.ShapeDtypeStruct((B, 1), jnp.float32),
                   jax.ShapeDtypeStruct((B, 1), jnp.float32)),
        grid_spec=pltpu.PrefetchScalarGridSpec(
            num_scalar_prefetch=0,
            grid=(gi, gk),
            in_specs=[pl.BlockSpec((bm, tk), lambda i, k: (i, k))],
            out_specs=[pl.BlockSpec((bm, 1), lambda i, k: (i, 0)),
                       pl.BlockSpec((bm, 1), lambda i, k: (i, 0))],
            scratch_shapes=[pltpu.VMEM((bm, 1), jnp.float32),
                            pltpu.VMEM((bm, 1), jnp.float32)],
        ),
        compiler_params=pltpu.CompilerParams(
            dimension_semantics=("parallel", "arbitrary"),
            vmem_limit_bytes=vmem_limit_bytes,
        ),
    )(x2)

    out = pl.pallas_call(
        _apply_kernel,
        out_shape=jax.ShapeDtypeStruct((B, D), x2.dtype),
        grid_spec=pltpu.PrefetchScalarGridSpec(
            num_scalar_prefetch=0,
            grid=(gi, gk),
            in_specs=[pl.BlockSpec((bm, tk), lambda i, k: (i, k)),
                      pl.BlockSpec((1, tk), lambda i, k: (0, k)),
                      pl.BlockSpec((1, tk), lambda i, k: (0, k)),
                      pl.BlockSpec((bm, 1), lambda i, k: (i, 0)),
                      pl.BlockSpec((bm, 1), lambda i, k: (i, 0))],
            out_specs=pl.BlockSpec((bm, tk), lambda i, k: (i, k)),
        ),
        compiler_params=pltpu.CompilerParams(
            dimension_semantics=("parallel", "parallel"),
            vmem_limit_bytes=vmem_limit_bytes,
        ),
    )(x2, w2, b2, mean, inv)
    return out


# -----------------------------------------------------------------------------
# Wrapper
# -----------------------------------------------------------------------------
def _vmem_params(vmem_budget_bytes, vmem_limit_bytes):
    """Per-generation VMEM tile budget and scoped limit."""
    if vmem_budget_bytes is not None and vmem_limit_bytes is not None:
        return vmem_budget_bytes, vmem_limit_bytes
    budget, limit = 16 << 20, 48 << 20        # conservative: safe on every gen
    try:
        cap = int(pltpu.get_tpu_info().vmem_capacity_bytes)
        if cap > (64 << 20):
            # 128-MiB parts (v5e/v6e): more headroom keeps large-D shapes at
            # full-width, double-buffered tiles.
            budget, limit = 24 << 20, 96 << 20
    except Exception:
        pass
    if vmem_budget_bytes is None:
        vmem_budget_bytes = budget
    if vmem_limit_bytes is None:
        vmem_limit_bytes = limit
    return vmem_budget_bytes, vmem_limit_bytes


def on_demand_layer_norm(x, weight, bias, *,
                         vmem_budget_bytes=None,
                         vmem_limit_bytes=None,
                         row_tile_cap=1024,
                         d_tile=512,
                         force_d_tiled=False):
    """LayerNorm over all non-batch dims; weight/bias have shape x.shape[1:]."""
    B = x.shape[0]
    D = 1
    for d in x.shape[1:]:
        D *= d

    vmem_budget_bytes, vmem_limit_bytes = _vmem_params(
        vmem_budget_bytes, vmem_limit_bytes)

    itemsize = jnp.dtype(x.dtype).itemsize
    sub = max(8, 32 // itemsize)              # sublane packing multiple

    x2 = x.reshape(B, D)
    w2 = weight.reshape(1, D)                 # keep native dtype; promote in-kernel
    b2 = bias.reshape(1, D)

    # Per-row VMEM footprint: double-buffered in + out tiles in x.dtype plus
    # f32 temporaries the compiler materializes (x, xc, y) — conservative.
    bytes_per_row = 4 * D * itemsize + 3 * D * 4
    use_d_tiled = force_d_tiled or (bytes_per_row * sub > vmem_budget_bytes)

    if use_d_tiled:
        tk = d_tile if d_tile else 512
        tk = max(_LANE, (tk // _LANE) * _LANE)
        if tk >= D:
            tk = D                            # single chunk: full-dim block is legal
        bytes_per_row_tk = 4 * tk * itemsize + 3 * tk * 4
        bm = vmem_budget_bytes // max(1, bytes_per_row_tk)
        bm = min(bm, 512)
        bm = min(bm, _round_up(B, sub))
        bm = max(sub, (bm // sub) * sub)
        out = _layer_norm_d_tiled(x2, w2, b2, B, D, bm=bm, tk=tk,
                                  vmem_limit_bytes=vmem_limit_bytes)
        return out.reshape(x.shape)

    # Row-tile size: budget-driven, capped at the ~roofline sweet spot, and
    # kept small enough to leave >=4 grid steps (pipelining + megacore) when
    # the batch allows it.
    bm = vmem_budget_bytes // bytes_per_row
    bm = min(bm, row_tile_cap)
    if B >= 4 * sub:
        bm = min(bm, max(sub, (B // 4) // sub * sub))
    bm = min(bm, _round_up(B, sub))
    bm = max(sub, (bm // sub) * sub)

    grid = (pl.cdiv(B, bm),)                  # no batch padding; tail tile masked
    kernel = functools.partial(_layernorm_row_kernel, d_true=float(D))

    cost = pl.CostEstimate(
        flops=8 * B * D,
        transcendentals=B,
        bytes_accessed=2 * B * D * itemsize
        + D * jnp.dtype(weight.dtype).itemsize
        + D * jnp.dtype(bias.dtype).itemsize,
    )

    out = pl.pallas_call(
        kernel,
        out_shape=jax.ShapeDtypeStruct((B, D), x.dtype),
        grid_spec=pltpu.PrefetchScalarGridSpec(
            num_scalar_prefetch=0,
            grid=grid,
            in_specs=[
                pl.BlockSpec((bm, D), lambda i: (i, 0)),   # x: new tile per step
                pl.BlockSpec((1, D), lambda i: (0, 0)),    # weight: fetched once
                pl.BlockSpec((1, D), lambda i: (0, 0)),    # bias: fetched once
            ],
            out_specs=pl.BlockSpec((bm, D), lambda i: (i, 0)),
        ),
        compiler_params=pltpu.CompilerParams(
            dimension_semantics=("parallel",),             # megacore on v7x
            vmem_limit_bytes=vmem_limit_bytes,
        ),
        cost_estimate=cost,
    )(x2, w2, b2)

    return out.reshape(x.shape)


def _reference(x, weight, bias):
    xf = x.astype(jnp.float32)
    axes = tuple(range(1, x.ndim))
    mean = jnp.mean(xf, axis=axes, keepdims=True)
    var = jnp.mean((xf - mean) ** 2, axis=axes, keepdims=True)
    y = (xf - mean) / jnp.sqrt(var + _EPS)
    return (y * weight.astype(jnp.float32) + bias.astype(jnp.float32)).astype(x.dtype)


if __name__ == "__main__":
    root = jax.random.PRNGKey(0)
    k1, k2 = jax.random.split(root)

    # TODO(synk): the lazy "create nn.LayerNorm on first forward" is host-side
    # module state; parameters are passed explicitly with nn.LayerNorm's
    # default init (weight=ones, bias=zeros) instead.
    B, C, H, W = 2, 4, 16, 16
    x = jax.random.normal(k1, (B, C, H, W), dtype=jnp.float32)
    weight = jnp.ones((C, H, W), dtype=jnp.float32)
    bias = jnp.zeros((C, H, W), dtype=jnp.float32)

    out = jax.block_until_ready(on_demand_layer_norm(x, weight, bias))
    ref = _reference(x, weight, bias)
    assert out.shape == x.shape
    assert jnp.allclose(out, ref, atol=1e-4, rtol=1e-4), "mismatch vs reference"

    # Unaligned shape (B not a multiple of 8, D=385 not a multiple of 128)
    # exercises the partial-tile masking that replaced the pad/slice passes.
    xu = jax.random.normal(k2, (3, 5, 7, 11), dtype=jnp.float32)
    wu = jnp.ones((5, 7, 11), dtype=jnp.float32)
    bu = jnp.zeros((5, 7, 11), dtype=jnp.float32)
    ou = jax.block_until_ready(on_demand_layer_norm(xu, wu, bu))
    assert jnp.allclose(ou, _reference(xu, wu, bu), atol=1e-4, rtol=1e-4), \
        "mismatch vs reference (unaligned shape)"

    # Force the feature-tiled (giant-D) fallback at a small shape, including a
    # partial last feature chunk, to validate that path too.
    od = jax.block_until_ready(
        on_demand_layer_norm(xu, wu, bu, force_d_tiled=True, d_tile=128))
    assert jnp.allclose(od, _reference(xu, wu, bu), atol=1e-4, rtol=1e-4), \
        "mismatch vs reference (D-tiled path)"

    print("KERNEL_OK")
</pallas_src>

<mosaic_0001>
module attributes {stable_mosaic.version = 11 : i64} {
  func.func @_layernorm_row_kernel(%arg0: i32, %arg1: memref<8x1024xf32, #tpu.memory_space<vmem>>, %arg2: memref<1x1024xf32, #tpu.memory_space<vmem>>, %arg3: memref<1x1024xf32, #tpu.memory_space<vmem>>, %arg4: memref<8x1024xf32, #tpu.memory_space<vmem>>) attributes {dimension_semantics = [#tpu.dimension_semantics<parallel>], iteration_bounds = array<i64: 1>, scalar_prefetch = 0 : i64, scratch_operands = 0 : i64, tpu.core_type = #tpu.core_type<tc>, window_params = [{transform_indices = @transform_0, window_bounds = array<i64: 8, 1024>}, {pipeline_mode = #tpu.pipeline_mode<synchronous>, transform_indices = @transform_1, window_bounds = array<i64: 1, 1024>}, {pipeline_mode = #tpu.pipeline_mode<synchronous>, transform_indices = @transform_2, window_bounds = array<i64: 1, 1024>}, {transform_indices = @transform_3, window_bounds = array<i64: 8, 1024>}]} {
    %c0 = arith.constant 0 : index
    %c0_0 = arith.constant 0 : index
    %0 = vector.load %arg1[%c0, %c0_0] : memref<8x1024xf32, #tpu.memory_space<vmem>>, vector<8x1024xf32>
    %cst = arith.constant dense<0.000000e+00> : vector<8xf32>
    %1 = vector.multi_reduction <add>, %0, %cst [1] : vector<8x1024xf32> to vector<8xf32>
    %2 = vector.shape_cast %1 : vector<8xf32> to vector<8x1xf32>
    %cst_1 = arith.constant 9.765625E-4 : f32
    %3 = vector.broadcast %cst_1 : f32 to vector<8x1xf32>
    %4 = arith.mulf %2, %3 : vector<8x1xf32>
    %5 = vector.broadcast %4 : vector<8x1xf32> to vector<8x1024xf32>
    %6 = arith.subf %0, %5 : vector<8x1024xf32>
    %7 = arith.mulf %6, %6 : vector<8x1024xf32>
    %cst_2 = arith.constant dense<0.000000e+00> : vector<8xf32>
    %8 = vector.multi_reduction <add>, %7, %cst_2 [1] : vector<8x1024xf32> to vector<8xf32>
    %9 = vector.shape_cast %8 : vector<8xf32> to vector<8x1xf32>
    %cst_3 = arith.constant 9.765625E-4 : f32
    %10 = vector.broadcast %cst_3 : f32 to vector<8x1xf32>
    %11 = arith.mulf %9, %10 : vector<8x1xf32>
    %cst_4 = arith.constant 9.99999974E-6 : f32
    %12 = vector.broadcast %cst_4 : f32 to vector<8x1xf32>
    %13 = arith.addf %11, %12 : vector<8x1xf32>
    %14 = math.rsqrt %13 : vector<8x1xf32>
    %15 = vector.broadcast %14 : vector<8x1xf32> to vector<8x1024xf32>
    %16 = arith.mulf %6, %15 : vector<8x1024xf32>
    %c0_5 = arith.constant 0 : index
    %c0_6 = arith.constant 0 : index
    %17 = vector.load %arg2[%c0_5, %c0_6] : memref<1x1024xf32, #tpu.memory_space<vmem>>, vector<1x1024xf32>
    %18 = vector.broadcast %17 : vector<1x1024xf32> to vector<8x1024xf32>
    %19 = arith.mulf %16, %18 : vector<8x1024xf32>
    %c0_7 = arith.constant 0 : index
    %c0_8 = arith.constant 0 : index
    %20 = vector.load %arg3[%c0_7, %c0_8] : memref<1x1024xf32, #tpu.memory_space<vmem>>, vector<1x1024xf32>
    %21 = vector.broadcast %20 : vector<1x1024xf32> to vector<8x1024xf32>
    %22 = arith.addf %19, %21 : vector<8x1024xf32>
    %c0_9 = arith.constant 0 : index
    %c0_10 = arith.constant 0 : index
    %23 = vector.load %arg4[%c0_9, %c0_10] : memref<8x1024xf32, #tpu.memory_space<vmem>>, vector<8x1024xf32>
    tpu.vector_store %arg4[%c0_9, %c0_10], %22 {strides = array<i32>} : memref<8x1024xf32, #tpu.memory_space<vmem>>, vector<8x1024xf32>,
    return
  }
  func.func @transform_0(%arg0: i32) -> (i32, i32) {
    %c0_i32 = arith.constant 0 : i32
    %c0_i32_0 = arith.constant 0 : i32
    return %arg0, %c0_i32 : i32, i32
  }
  func.func @transform_1(%arg0: i32) -> (i32, i32) {
    %c0_i32 = arith.constant 0 : i32
    %c0_i32_0 = arith.constant 0 : i32
    %c0_i32_1 = arith.constant 0 : i32
    return %c0_i32, %c0_i32_0 : i32, i32
  }
  func.func @transform_2(%arg0: i32) -> (i32, i32) {
    %c0_i32 = arith.constant 0 : i32
    %c0_i32_0 = arith.constant 0 : i32
    %c0_i32_1 = arith.constant 0 : i32
    return %c0_i32, %c0_i32_0 : i32, i32
  }
  func.func @transform_3(%arg0: i32) -> (i32, i32) {
    %c0_i32 = arith.constant 0 : i32
    %c0_i32_0 = arith.constant 0 : i32
    return %arg0, %c0_i32 : i32, i32
  }
}

</mosaic_0001>

<bundles_post_ra>
// kernel: tpu_custom_call.1
= control target key start
LH: loop header
LB: loop body
LE: loop exit
PB: predicated region body
PF: predicated region fallthrough
CT: control target
= control target key end

     0   :  { %8 = vsyncpa [#allocation3], 0  ;;  %s931_s0 = inlined_call_operand.hbm [shape: f32[2,1024], index: 0, kind: input, shape index: {}]   ;;  %s932_s1 = inlined_call_operand.hbm [shape: f32[1,1024], index: 1, kind: input, shape index: {}]   ;;  %s933_s2 = inlined_call_operand.hbm [shape: f32[1,1024], index: 2, kind: input, shape index: {}]   ;;  %s934_s3 = inlined_call_operand.hbm [shape: f32[2,1024], index: 3, kind: output, shape index: {}]  }
   0x1   :  { %9 = vsyncpa [#allocation6], 0 }
   0x2   :  { %10 = vsyncpa [#allocation4], 0 }
   0x3   :  { %15 = vsyncadd [#allocation3], 768  ;;  %s733_s12 = smov [#allocation5]   ;;  %s734_s14 = smov [#allocation2]  }
   0x4   :  { %s29_s13 = sshll.u32 %s733_s12, 4  ;;  %s16_s15 = sshll.u32 %s734_s14, 4  ;;  %s30_s13 = int_to_ptr.vmem [resolvable:$true] %s29_s13  ;;  %s764_s15 = int_to_ptr.vmem [resolvable:$true] %s16_s15 }
   0x5   :  { %s639_s18 = scalar_lea.hbm %s932_s1, 128 }
   0x6   :  { %p640_p0 = scmp.ne.s32.totalorder %s932_s1, %s639_s18  ;;  %p643_p1 = scmp.lt.u32.totalorder %s639_s18, %s932_s1 }
   0x8   :  { %p645_p2 = pnand %p643_p1, %p640_p0 }
   0xa   :  { %648 = shalt.err (!%p645_p2)
}
   0xb   :  { %s649_s23 = scalar_lea.vmem %s30_s13, 128  ;;  %p654_p4 = scmp.lt.s32.totalorder %s30_s13, %s30_s13 }
   0xc   :  { %p650_p3 = scmp.ne.s32.totalorder %s30_s13, %s649_s23  ;;  %p655_p5 = scmp.lt.s32.totalorder %s649_s23, %s649_s23 }
   0xe   :  { %p656_p6 = por %p655_p5, %p654_p4 }
  0x10   :  { %p657_p7 = pnand %p656_p6, %p650_p3 }
  0x12   :  { %660 = shalt.err (!%p657_p7)
}
  0x13   :  { %32 = dma.hbm_to_vmem [thread:$0]  %s932_s1, 128, %s30_s13, [#allocation6]  }
  0x14   :  { %s661_s28 = scalar_lea.hbm %s931_s0, 256 }
  0x15   :  { %p662_p8 = scmp.ne.s32.totalorder %s931_s0, %s661_s28  ;;  %p665_p9 = scmp.lt.u32.totalorder %s661_s28, %s931_s0 }
  0x17   :  { %p667_p10 = pnand %p665_p9, %p662_p8 }
  0x19   :  { %670 = shalt.err (!%p667_p10)
}
  0x1a   :  { %s671_s6 = scalar_lea.vmem %s764_s15, 256  ;;  %s675_s1 = scalar_lea.vmem %s764_s15, 1024 }
  0x1b   :  { %p672_p11 = scmp.ne.s32.totalorder %s764_s15, %s671_s6  ;;  %p676_p12 = scmp.lt.s32.totalorder %s764_s15, %s764_s15 }
  0x1c   :  { %p677_p13 = scmp.lt.s32.totalorder %s675_s1, %s671_s6 }
  0x1e   :  { %p678_p0 = por %p677_p13, %p676_p12 }
  0x20   :  { %p679_p1 = pnand %p678_p0, %p672_p11 }
  0x22   :  { %682 = shalt.err (!%p679_p1)
}
  0x23   :  { %s735_s7 = smov 256   ;;  %s736_s8 = smov 16  }
  0x24   :  { %22 = dma.hbm_to_vmem [thread:$0]  %s931_s0, 256, %s764_s15, [#allocation3], %s735_s7, %s735_s7, %s736_s8  }
  0x25   :  { %s737_s11 = smov [#allocation7]   ;;  %s683_s16 = scalar_lea.hbm %s933_s2, 128 }
  0x26   :  { %s39_s12 = sshll.u32 %s737_s11, 4  ;;  %p684_p2 = scmp.ne.s32.totalorder %s933_s2, %s683_s16  ;;  %s40_s12 = int_to_ptr.vmem [resolvable:$true] %s39_s12 }
  0x27   :  { %p687_p3 = scmp.lt.u32.totalorder %s683_s16, %s933_s2 }
  0x29   :  { %p689_p4 = pnand %p687_p3, %p684_p2 }
  0x2b   :  { %692 = shalt.err (!%p689_p4)
}
  0x2c   :  { %s693_s21 = scalar_lea.vmem %s40_s12, 128  ;;  %p698_p6 = scmp.lt.s32.totalorder %s40_s12, %s40_s12 }
  0x2d   :  { %p694_p5 = scmp.ne.s32.totalorder %s40_s12, %s693_s21  ;;  %p699_p7 = scmp.lt.s32.totalorder %s693_s21, %s693_s21 }
  0x2f   :  { %p700_p8 = por %p699_p7, %p698_p6 }
  0x31   :  { %p701_p9 = pnand %p700_p8, %p694_p5 }
  0x33   :  { %704 = shalt.err (!%p701_p9)
}
  0x34   :  { %42 = dma.hbm_to_vmem [thread:$0]  %s933_s2, 128, %s40_s12, [#allocation6]  }
  0x35   :  { %727 = dma.done.wait [#allocation3], 1024  }
  0x36   :  { %728 = vsyncadd [#allocation3], 4294966272 }
  0x37   :  { %729 = dma.done.wait [#allocation6], 256  }
  0x38   :  { %730 = vsyncadd [#allocation6], 4294967040  ;;  %v75_v0 = vlaneseq  ;;  %v738_v1 = vmov 1983009808   ;;  %v52_v6 = vld [vmem:[#allocation2] sm:$0xff]  ;;  %v53_v7 = vld [vmem:[#allocation2 + $0x8] sm:$0xff] }
  0x39   :  { %v73_v2 = vunpack.c.l.s4 %v738_v1  ;;  %v54_v8 = vld [vmem:[#allocation2 + $0x10] sm:$0xff]  ;;  %v55_v9 = vld [vmem:[#allocation2 + $0x18] sm:$0xff]  ;;  %v56_v10 = vld [vmem:[#allocation2 + $0x20] sm:$0xff]  ;;  %v739_v45 = vmov 269488144  }
  0x3a   :  { %v811_v3 = vshrl.u32 %v75_v0, 7  ;;  %v57_v11 = vld [vmem:[#allocation2 + $0x28] sm:$0xff]  ;;  %v68_v12 = vcombine.low %v52_v6, %v54_v8  ;;  %v69_v13 = vcombine.high %v52_v6, %v54_v8  ;;  %v58_v14 = vld [vmem:[#allocation2 + $0x30] sm:$0xff]  ;;  %v59_v15 = vld [vmem:[#allocation2 + $0x38] sm:$0xff]  ;;  %v104_v16 = vcombine.low %v53_v7, %v55_v9 }
  0x3b   :  { %v74_v4 = vunpack.c.0.s8 %v73_v2  ;;  %v70_v17 = vcombine.low %v56_v10, %v58_v14  ;;  %v71_v18 = vcombine.high %v56_v10, %v58_v14  ;;  %v106_v21 = vcombine.low %v57_v11, %v59_v15 }
  0x3c   :  { %v105_v24 = vcombine.high %v53_v7, %v55_v9  ;;  %v107_v25 = vcombine.high %v57_v11, %v59_v15  ;;  %v160_v46 = vunpack.c.l.s4 %v739_v45  ;;  %v740_v47 = vmov 842150450  }
  0x3d   :  { %v814_v5 = vsub.s32 %v74_v4, %v811_v3  ;;  %v167_v48 = vunpack.c.l.s4 %v740_v47  ;;  %v741_v49 = vmov 1414812756   ;;  %v742_v51 = vmov 1987475062  }
  0x3e   :  { %v174_v50 = vunpack.c.l.s4 %v741_v49  ;;  %v181_v52 = vunpack.c.l.s4 %v742_v51  ;;  %v161_v53 = vunpack.c.0.s8 %v160_v46 }
  0x3f   :  { %v78_v19 = vrot.slane %v68_v12, %v814_v5  ;;  %v85_v20 = vrot.slane %v69_v13, %v814_v5  ;;  %v92_v22 = vrot.slane %v70_v17, %v814_v5  ;;  %v99_v23 = vrot.slane %v71_v18, %v814_v5 }
  0x40   :  { %v114_v26 = vrot.slane %v104_v16, %v814_v5  ;;  %v128_v30 = vrot.slane %v106_v21, %v814_v5  ;;  %v121_v33 = vrot.slane %v105_v24, %v814_v5  ;;  %v135_v34 = vrot.slane %v107_v25, %v814_v5 }
  0x41   :  { %v100_v27 = vcombine.low %v78_v19, %v92_v22  ;;  %v101_v28 = vcombine.high %v78_v19, %v92_v22  ;;  %v102_v29 = vcombine.low %v85_v20, %v99_v23  ;;  %v103_v31 = vcombine.high %v85_v20, %v99_v23 }
  0x42   :  { %v136_v35 = vcombine.low %v114_v26, %v128_v30  ;;  %v137_v37 = vcombine.high %v114_v26, %v128_v30  ;;  %v138_v39 = vcombine.low %v121_v33, %v135_v34  ;;  %v139_v41 = vcombine.high %v121_v33, %v135_v34 }
  0x43   :  { %v148_v32 = vadd.f32 %v101_v28, %v100_v27  ;;  %v168_v54 = vunpack.c.0.s8 %v167_v48  ;;  %v175_v55 = vunpack.c.0.s8 %v174_v50  ;;  %v182_v56 = vunpack.c.0.s8 %v181_v52 }
  0x44   :  { %v825_v57 = vsub.s32 %v161_v53, %v811_v3  ;;  %v352_v52 = vsub.s32 0, %v811_v3  ;;  %v356_v53 = vsub.s32 1, %v811_v3 }
  0x45   :  { %v149_v36 = vadd.f32 %v148_v32, %v102_v29  ;;  %v828_v58 = vsub.s32 %v168_v54, %v811_v3  ;;  %v831_v59 = vsub.s32 %v175_v55, %v811_v3  ;;  %v834_v60 = vsub.s32 %v182_v56, %v811_v3  ;;  %v348_v54 = vld [vmem:[#allocation5] sm:$0xff] }
  0x46   :  { %v360_v55 = vsub.s32 2, %v811_v3  ;;  %v364_v56 = vsub.s32 3, %v811_v3 }
  0x47   :  { %v150_v38 = vadd.f32 %v149_v36, %v103_v31 }
  0x49   :  { %v151_v40 = vadd.f32 %v150_v38, %v136_v35 }
  0x4b   :  { %v152_v42 = vadd.f32 %v151_v40, %v137_v37 }
  0x4d   :  { %v153_v43 = vadd.f32 %v152_v42, %v138_v39 }
  0x4f   :  { %v154_v44 = vadd.f32 %v153_v43, %v139_v41 }
  0x51   :  { %155 = vadd.xlane.f32.xlu0 %v154_v44 }
  0xde   :  { %v156_v61 = vpop.xlane.xlu0 %155 }
  0xdf   :  { %v157_v62 = vmul.f32 0.0009765625, %v156_v61  ;;  %v368_v61 = vsub.s32 4, %v811_v3 }
  0xe1   :  { %v165_v63 = vrot.slane %v157_v62, %v825_v57  ;;  %v172_v0 = vrot.slane %v157_v62, %v828_v58  ;;  %v179_v1 = vrot.slane %v157_v62, %v831_v59  ;;  %v186_v2 = vrot.slane %v157_v62, %v834_v60 }
  0xe2   :  { %v372_v62 = vsub.s32 5, %v811_v3 }
  0xe3   :  { %v840_v4 = vsub.f32 %v52_v6, %v165_v63  ;;  %v842_v12 = vsub.f32 %v53_v7, %v165_v63  ;;  %v844_v13 = vsub.f32 %v54_v8, %v172_v0  ;;  %v846_v16 = vsub.f32 %v55_v9, %v172_v0 }
  0xe4   :  { %v848_v17 = vsub.f32 %v56_v10, %v179_v1  ;;  %v850_v18 = vsub.f32 %v57_v11, %v179_v1  ;;  %v852_v19 = vsub.f32 %v58_v14, %v186_v2  ;;  %v854_v20 = vsub.f32 %v59_v15, %v186_v2 }
  0xe5   :  { %v199_v21 = vmul.f32 %v840_v4, %v840_v4  ;;  %v201_v6 = vmul.f32 %v844_v13, %v844_v13  ;;  %v200_v7 = vmul.f32 %v842_v12, %v842_v12  ;;  %v202_v8 = vmul.f32 %v846_v16, %v846_v16 }
  0xe6   :  { %v203_v9 = vmul.f32 %v848_v17, %v848_v17  ;;  %v205_v10 = vmul.f32 %v852_v19, %v852_v19  ;;  %v204_v11 = vmul.f32 %v850_v18, %v850_v18  ;;  %v206_v14 = vmul.f32 %v854_v20, %v854_v20 }
  0xe7   :  { %v215_v15 = vcombine.low %v199_v21, %v201_v6  ;;  %v216_v22 = vcombine.high %v199_v21, %v201_v6  ;;  %v251_v26 = vcombine.low %v200_v7, %v202_v8  ;;  %v252_v33 = vcombine.high %v200_v7, %v202_v8  ;;  %v470_v21 = vld [vmem:[#allocation7] sm:$0xff] }
  0xe8   :  { %v217_v23 = vcombine.low %v203_v9, %v205_v10  ;;  %v218_v24 = vcombine.high %v203_v9, %v205_v10  ;;  %v253_v30 = vcombine.low %v204_v11, %v206_v14  ;;  %v254_v34 = vcombine.high %v204_v11, %v206_v14 }
  0xe9   :  { %v225_v25 = vrot.slane %v215_v15, %v814_v5  ;;  %v232_v28 = vrot.slane %v216_v22, %v814_v5  ;;  %v261_v36 = vrot.slane %v251_v26, %v814_v5  ;;  %v268_v41 = vrot.slane %v252_v33, %v814_v5 }
  0xea   :  { %v239_v27 = vrot.slane %v217_v23, %v814_v5  ;;  %v246_v29 = vrot.slane %v218_v24, %v814_v5  ;;  %v275_v37 = vrot.slane %v253_v30, %v814_v5  ;;  %v282_v42 = vrot.slane %v254_v34, %v814_v5 }
  0xeb   :  { %v353_v63 = vrot.slane %v348_v54, %v352_v52  ;;  %v357_v0 = vrot.slane %v348_v54, %v356_v53  ;;  %v376_v1 = vsub.s32 6, %v811_v3  ;;  %v380_v2 = vsub.s32 7, %v811_v3 }
  0xec   :  { %v247_v31 = vcombine.low %v225_v25, %v239_v27  ;;  %v248_v32 = vcombine.high %v225_v25, %v239_v27  ;;  %v249_v35 = vcombine.low %v232_v28, %v246_v29  ;;  %v250_v39 = vcombine.high %v232_v28, %v246_v29 }
  0xed   :  { %v283_v43 = vcombine.low %v261_v36, %v275_v37  ;;  %v284_v45 = vcombine.high %v261_v36, %v275_v37  ;;  %v285_v47 = vcombine.low %v268_v41, %v282_v42  ;;  %v286_v49 = vcombine.high %v268_v41, %v282_v42 }
  0xee   :  { %v295_v38 = vadd.f32 %v248_v32, %v247_v31  ;;  %v361_v6 = vrot.slane %v348_v54, %v360_v55  ;;  %v365_v7 = vrot.slane %v348_v54, %v364_v56  ;;  %v369_v9 = vrot.slane %v348_v54, %v368_v61 }
  0xef   :  { %v373_v10 = vrot.slane %v348_v54, %v372_v62  ;;  %v377_v14 = vrot.slane %v348_v54, %v376_v1  ;;  %v381_v15 = vrot.slane %v348_v54, %v380_v2  ;;  %v382_v22 = vcombine.low %v353_v63, %v357_v0 }
  0xf0   :  { %v296_v40 = vadd.f32 %v295_v38, %v249_v35  ;;  %v475_v23 = vrot.slane %v470_v21, %v352_v52  ;;  %v479_v24 = vrot.slane %v470_v21, %v356_v53  ;;  %v483_v25 = vrot.slane %v470_v21, %v360_v55 }
  0xf1   :  { %v487_v26 = vrot.slane %v470_v21, %v364_v56  ;;  %v383_v28 = vcombine.high %v353_v63, %v357_v0  ;;  %v384_v29 = vcombine.low %v361_v6, %v365_v7  ;;  %v385_v30 = vcombine.high %v361_v6, %v365_v7 }
  0xf2   :  { %v297_v44 = vadd.f32 %v296_v40, %v250_v39  ;;  %v491_v31 = vrot.slane %v470_v21, %v368_v61  ;;  %v495_v3 = vrot.slane %v470_v21, %v372_v62  ;;  %v499_v32 = vrot.slane %v470_v21, %v376_v1 }
  0xf3   :  { %v503_v33 = vrot.slane %v470_v21, %v380_v2  ;;  %v418_v34 = vcombine.low %v369_v9, %v373_v10  ;;  %v419_v35 = vcombine.high %v369_v9, %v373_v10  ;;  %v420_v36 = vcombine.low %v377_v14, %v381_v15 }
  0xf4   :  { %v298_v46 = vadd.f32 %v297_v44, %v283_v43  ;;  %v421_v37 = vcombine.high %v377_v14, %v381_v15  ;;  %v504_v38 = vcombine.low %v475_v23, %v479_v24  ;;  %v505_v39 = vcombine.high %v475_v23, %v479_v24 }
  0xf5   :  { %v506_v40 = vcombine.low %v483_v25, %v487_v26  ;;  %v507_v41 = vcombine.high %v483_v25, %v487_v26  ;;  %v392_v42 = vrot.slane %v382_v22, %v814_v5  ;;  %v399_v43 = vrot.slane %v383_v28, %v814_v5 }
  0xf6   :  { %v299_v48 = vadd.f32 %v298_v46, %v284_v45  ;;  %v406_v44 = vrot.slane %v384_v29, %v814_v5  ;;  %v413_v45 = vrot.slane %v385_v30, %v814_v5  ;;  %v540_v46 = vcombine.low %v491_v31, %v495_v3 }
  0xf7   :  { %v442_v52 = vrot.slane %v420_v36, %v814_v5  ;;  %v449_v53 = vrot.slane %v421_v37, %v814_v5  ;;  %v514_v54 = vrot.slane %v504_v38, %v814_v5  ;;  %v521_v55 = vrot.slane %v505_v39, %v814_v5 }
  0xf8   :  { %v300_v50 = vadd.f32 %v299_v48, %v285_v47  ;;  %v541_v47 = vcombine.high %v491_v31, %v495_v3  ;;  %v542_v48 = vcombine.low %v499_v32, %v503_v33  ;;  %v528_v56 = vrot.slane %v506_v40, %v814_v5 }
  0xf9   :  { %v535_v61 = vrot.slane %v507_v41, %v814_v5  ;;  %v414_v62 = vcombine.low %v392_v42, %v406_v44  ;;  %v415_v63 = vcombine.high %v392_v42, %v406_v44  ;;  %v416_v0 = vcombine.low %v399_v43, %v413_v45 }
  0xfa   :  { %v301_v51 = vadd.f32 %v300_v50, %v286_v49  ;;  %v543_v49 = vcombine.high %v499_v32, %v503_v33  ;;  %v428_v50 = vrot.slane %v418_v34, %v814_v5  ;;  %v417_v1 = vcombine.high %v399_v43, %v413_v45 }
  0xfb   :  { %v550_v2 = vrot.slane %v540_v46, %v814_v5  ;;  %v557_v21 = vrot.slane %v541_v47, %v814_v5  ;;  %v564_v6 = vrot.slane %v542_v48, %v814_v5  ;;  %v536_v15 = vcombine.low %v514_v54, %v528_v56 }
  0xfc   :  { %302 = vadd.xlane.f32.xlu0 %v301_v51  ;;  %v435_v51 = vrot.slane %v419_v35, %v814_v5  ;;  %v571_v7 = vrot.slane %v543_v49, %v814_v5  ;;  %v451_v9 = vcombine.high %v428_v50, %v442_v52  ;;  %v537_v22 = vcombine.high %v514_v54, %v528_v56 }
  0xfd   :  { %v538_v23 = vcombine.low %v521_v55, %v535_v61  ;;  %v539_v24 = vcombine.high %v521_v55, %v535_v61  ;;  %v572_v29 = vcombine.low %v550_v2, %v564_v6  ;;  %v573_v30 = vcombine.high %v550_v2, %v564_v6 }
  0xfe   :  { %v452_v10 = vcombine.low %v435_v51, %v449_v53  ;;  %v574_v5 = vcombine.low %v557_v21, %v571_v7  ;;  %v575_v31 = vcombine.high %v557_v21, %v571_v7 }
 0x189   :  { %v303_v8 = vpop.xlane.xlu0 %302 }
 0x18a   :  { %v304_v11 = vmul.f32 0.0009765625, %v303_v8  ;;  %v450_v8 = vcombine.low %v428_v50, %v442_v52 }
 0x18c   :  { %v305_v27 = vadd.f32 1e-05, %v304_v11  ;;  %v453_v11 = vcombine.high %v435_v51, %v449_v53 }
 0x18e   :  { %637 = vrsqrt.f32 %v305_v27 }
 0x198   :  { %v638_v14 = vpop.eup %637 }
 0x199   :  { %v314_v25 = vrot.slane %v638_v14, %v825_v57  ;;  %v321_v26 = vrot.slane %v638_v14, %v828_v58  ;;  %v328_v27 = vrot.slane %v638_v14, %v831_v59  ;;  %v335_v28 = vrot.slane %v638_v14, %v834_v60 }
 0x19b   :  { %v340_v3 = vmul.f32 %v314_v25, %v840_v4  ;;  %v341_v32 = vmul.f32 %v314_v25, %v842_v12  ;;  %v342_v33 = vmul.f32 %v321_v26, %v844_v13  ;;  %v343_v34 = vmul.f32 %v321_v26, %v846_v16 }
 0x19c   :  { %v344_v57 = vmul.f32 %v328_v27, %v848_v17  ;;  %v345_v58 = vmul.f32 %v328_v27, %v850_v18  ;;  %v346_v59 = vmul.f32 %v335_v28, %v852_v19  ;;  %v347_v60 = vmul.f32 %v335_v28, %v854_v20 }
 0x19d   :  { %v462_v35 = vmul.f32 %v414_v62, %v340_v3  ;;  %v463_v36 = vmul.f32 %v450_v8, %v341_v32  ;;  %v464_v37 = vmul.f32 %v415_v63, %v342_v33  ;;  %v465_v38 = vmul.f32 %v451_v9, %v343_v34 }
 0x19e   :  { %v466_v39 = vmul.f32 %v416_v0, %v344_v57  ;;  %v467_v4 = vmul.f32 %v452_v10, %v345_v58  ;;  %v468_v40 = vmul.f32 %v417_v1, %v346_v59  ;;  %v469_v12 = vmul.f32 %v453_v11, %v347_v60 }
 0x19f   :  { %v584_v41 = vadd.f32 %v536_v15, %v462_v35  ;;  %v585_v13 = vadd.f32 %v572_v29, %v463_v36  ;;  %v586_v42 = vadd.f32 %v537_v22, %v464_v37  ;;  %v587_v16 = vadd.f32 %v573_v30, %v465_v38 }
 0x1a0   :  { %v588_v43 = vadd.f32 %v538_v23, %v466_v39  ;;  %v589_v17 = vadd.f32 %v574_v5, %v467_v4  ;;  %v590_v44 = vadd.f32 %v539_v24, %v468_v40  ;;  %v591_v18 = vadd.f32 %v575_v31, %v469_v12 }
 0x1a1   :  { %592 = vst [vmem:[#allocation8] sm:$0xff] %v584_v41  ;;  %593 = vst [vmem:[#allocation8 + $0x8] sm:$0xff] %v585_v13 }
 0x1a2   :  { %594 = vst [vmem:[#allocation8 + $0x10] sm:$0xff] %v586_v42  ;;  %595 = vst [vmem:[#allocation8 + $0x18] sm:$0xff] %v587_v16 }
 0x1a3   :  { %596 = vst [vmem:[#allocation8 + $0x20] sm:$0xff] %v588_v43  ;;  %597 = vst [vmem:[#allocation8 + $0x28] sm:$0xff] %v589_v17 }
 0x1a4   :  { %598 = vst [vmem:[#allocation8 + $0x30] sm:$0xff] %v590_v44  ;;  %599 = vst [vmem:[#allocation8 + $0x38] sm:$0xff] %v591_v18 }
 0x1a5   :  { %604 = vsyncadd [#allocation4], 768  ;;  %s743_s2 = smov [#allocation8]  }
 0x1a6   :  { %s605_s22 = sshll.u32 %s743_s2, 4  ;;  %s606_s22 = int_to_ptr.vmem [resolvable:$true] %s605_s22 }
 0x1a7   :  { %s705_s23 = scalar_lea.vmem %s606_s22, 256  ;;  %s709_s24 = scalar_lea.vmem %s606_s22, 1024 }
 0x1a8   :  { %p706_p10 = scmp.ne.s32.totalorder %s606_s22, %s705_s23  ;;  %p710_p11 = scmp.lt.s32.totalorder %s606_s22, %s606_s22 }
 0x1a9   :  { %p711_p12 = scmp.lt.s32.totalorder %s709_s24, %s705_s23 }
 0x1ab   :  { %p712_p13 = por %p711_p12, %p710_p11 }
 0x1ad   :  { %p713_p0 = pnand %p712_p13, %p706_p10 }
 0x1af   :  { %716 = shalt.err (!%p713_p0)
}
 0x1b0   :  { %s717_s27 = scalar_lea.hbm %s934_s3, 256 }
 0x1b1   :  { %p718_p1 = scmp.ne.s32.totalorder %s934_s3, %s717_s27  ;;  %p721_p2 = scmp.lt.u32.totalorder %s717_s27, %s934_s3 }
 0x1b3   :  { %p723_p3 = pnand %p721_p2, %p718_p1 }
 0x1b5   :  { %726 = shalt.err (!%p723_p3)
}
 0x1b6   :  { %611 = dma.vmem_to_hbm [thread:$0]  %s606_s22, 256, %s934_s3, [#allocation4], %s735_s7, %s735_s7, %s736_s8  }
 0x1b7   :  { %731 = dma.done.wait [#allocation4], 1024  }
 0x1b8   :  { %732 = vsyncadd [#allocation4], 4294966272 }
 0x1b9   :  { %615 = vsyncpa [#allocation3], 1 }
 0x1ba   :  { %616 = vsyncpa [#allocation6], 1 }
 0x1bb   :  { %617 = vsyncpa [#allocation4], 1 }

</bundles_post_ra>
